<compile_context>
chip_gen: v7x
topology: tpu7x:2x2x1
jax: 0.10.0
libtpu: 0.0.40
codegen_flags: <defaults>
</compile_context>

<pallas_src>
from functools import partial

import jax
import jax.numpy as jnp
from jax.experimental import pallas as pl
from jax.experimental.pallas import tpu as pltpu  # noqa: F401  (TPU backend)


# --------------------------------------------------------------------------
# Kernels (gridless: every operand is a full-array VMEM block)
# --------------------------------------------------------------------------
def _kernel_fused(s_ref, a_ref, w1s_ref, w1a_ref, b1_ref,
                  w2_ref, b2_ref, w3_ref, b3_ref, o_ref):
    """v6e/v7x path: layers 2 and 3 fused across the ensemble (block-diag)."""
    # Layer 1, fused across ensemble members; state/action concat folded in:
    #   [s, a] @ W1 == s @ W1[:sd] + a @ W1[sd:]
    h1 = jnp.maximum(
        jnp.dot(s_ref[...], w1s_ref[...], preferred_element_type=jnp.float32)
        + jnp.dot(a_ref[...], w1a_ref[...], preferred_element_type=jnp.float32)
        + b1_ref[...], 0.0)                                        # (B, n_Q*H1)
    # Layer 2: one 256-wide block-diagonal matmul instead of n_Q 128-wide ones.
    h2 = jnp.maximum(
        jnp.dot(h1, w2_ref[...], preferred_element_type=jnp.float32)
        + b2_ref[...], 0.0)                                        # (B, n_Q*H2)
    # Layer 3: block-diagonal (n_Q*H2, n_Q) weight -> (B, n_Q) directly; no
    # per-member reduce and no concatenate feeding the masked output store.
    o_ref[...] = (jnp.dot(h2, w3_ref[...], preferred_element_type=jnp.float32)
                  + b3_ref[...]).astype(o_ref.dtype)


def _kernel_per_member(s_ref, a_ref, w1s_ref, w1a_ref, b1_ref,
                       w2_ref, b2_ref, w3_ref, b3_ref, o_ref, *, n_Q, H1):
    """v5e path: keep the native 128-wide per-member layer-2 matmuls."""
    h1 = jnp.maximum(
        jnp.dot(s_ref[...], w1s_ref[...], preferred_element_type=jnp.float32)
        + jnp.dot(a_ref[...], w1a_ref[...], preferred_element_type=jnp.float32)
        + b1_ref[...], 0.0)                                        # (B, n_Q*H1)
    cols = []
    for q in range(n_Q):                                           # static unroll
        hq = h1[:, q * H1:(q + 1) * H1]                            # lane-aligned
        h2 = jnp.maximum(
            jnp.dot(hq, w2_ref[q], preferred_element_type=jnp.float32)
            + b2_ref[q], 0.0)                                      # (B, H2)
        # Layer 3 as VPU mul + lane (XLU) reduction; w3_ref[q] is (1, H2).
        cols.append(jnp.sum(h2 * w3_ref[q], axis=-1, keepdims=True))
    o_ref[...] = (jnp.concatenate(cols, axis=-1) + b3_ref[...]).astype(o_ref.dtype)


# --------------------------------------------------------------------------
# One-time weight packing (hoisted out of the per-call forward path)
# --------------------------------------------------------------------------
def _block_diag(blocks):
    n = len(blocks)
    rows = []
    for i, bi in enumerate(blocks):
        row = [bi if j == i
               else jnp.zeros((bi.shape[0], blocks[j].shape[1]), bi.dtype)
               for j in range(n)]
        rows.append(jnp.concatenate(row, axis=1))
    return jnp.concatenate(rows, axis=0)


def _mxu_is_256_wide():
    """True on v6e / v7x (2x256^2 MXU); False on v5 generation (128-wide)."""
    try:
        kind = jax.devices()[0].device_kind.lower()
    except Exception:
        return True
    return "v5" not in kind


def pack_params(params, state_dim, fused=None):
    """Repack per-member params ONCE into the fused kernel layout."""
    w1, b1, w2, b2, w3, b3 = params
    n_Q, in_dim, H1 = w1.shape
    H2 = w2.shape[-1]
    if fused is None:
        fused = _mxu_is_256_wide()

    # Fused layer-1 weight (in_dim, n_Q*H1); column block q == member q.
    w1_fused = jnp.transpose(w1, (1, 0, 2)).reshape(in_dim, n_Q * H1)
    w1s = w1_fused[:state_dim]                       # (state_dim,  n_Q*H1)
    w1a = w1_fused[state_dim:]                       # (action_dim, n_Q*H1)
    b1p = b1.reshape(1, n_Q * H1)
    b3p = b3.reshape(1, n_Q)

    if fused:
        w2p = _block_diag([w2[q] for q in range(n_Q)])   # (n_Q*H1, n_Q*H2)
        b2p = b2.reshape(1, n_Q * H2)
        w3p = _block_diag([w3[q] for q in range(n_Q)])   # (n_Q*H2, n_Q)
    else:
        w2p = w2                                         # (n_Q, H1, H2)
        b2p = b2                                         # (n_Q, 1, H2)
        w3p = jnp.transpose(w3, (0, 2, 1))               # (n_Q, 1, H2)

    tensors = tuple(jnp.asarray(t, jnp.float32)
                    for t in (w1s, w1a, b1p, w2p, b2p, w3p, b3p))
    meta = dict(fused=bool(fused), n_Q=int(n_Q), H1=int(H1))
    return tensors, meta


# --------------------------------------------------------------------------
# Forward wrapper: nothing per-call but the pallas_call itself
# --------------------------------------------------------------------------
def ensemble_critic_forward(state, action, packed_tensors, *, fused, n_Q, H1):
    """state: (B, state_dim), action: (B, action_dim); returns (B, n_Q)."""
    B = state.shape[0]
    kernel = (_kernel_fused if fused
              else partial(_kernel_per_member, n_Q=n_Q, H1=H1))
    return pl.pallas_call(
        kernel,
        out_shape=jax.ShapeDtypeStruct((B, n_Q), jnp.float32),
    )(state.astype(jnp.float32), action.astype(jnp.float32), *packed_tensors)


# --------------------------------------------------------------------------
# Params init (PyTorch nn.Linear-style) and pure-JAX reference
# --------------------------------------------------------------------------
def init_params(key, state_dim, action_dim, hidden_dims=(128, 128), n_Q=2):
    """U(-1/sqrt(fan_in), +1/sqrt(fan_in)) for both W and b, like nn.Linear."""
    dims = [state_dim + action_dim, hidden_dims[0], hidden_dims[1], 1]
    keys = jax.random.split(key, 6 * n_Q)
    Ws, Bs = [], []
    ki = 0
    for li in range(3):
        fan_in, fan_out = dims[li], dims[li + 1]
        bound = 1.0 / jnp.sqrt(float(fan_in))
        w_list, b_list = [], []
        for _ in range(n_Q):
            w = jax.random.uniform(keys[ki], (fan_in, fan_out),
                                   minval=-bound, maxval=bound, dtype=jnp.float32)
            ki += 1
            b = jax.random.uniform(keys[ki], (1, fan_out),
                                   minval=-bound, maxval=bound, dtype=jnp.float32)
            ki += 1
            w_list.append(w)
            b_list.append(b)
        Ws.append(jnp.stack(w_list, axis=0))   # (n_Q, fan_in, fan_out)
        Bs.append(jnp.stack(b_list, axis=0))   # (n_Q, 1, fan_out)
    return (Ws[0], Bs[0], Ws[1], Bs[1], Ws[2], Bs[2])


def reference_forward(state, action, params):
    x = jnp.concatenate([state, action], axis=-1).astype(jnp.float32)
    w1, b1, w2, b2, w3, b3 = params
    cols = []
    for q in range(w1.shape[0]):
        h = jnp.maximum(x @ w1[q] + b1[q], 0.0)
        h = jnp.maximum(h @ w2[q] + b2[q], 0.0)
        cols.append(h @ w3[q] + b3[q])
    return jnp.concatenate(cols, axis=-1)


if __name__ == "__main__":
    state_dim, action_dim = 12, 4
    hidden_dims = (128, 128)
    n_Q = 2
    batch = 8

    key = jax.random.PRNGKey(0)
    k_state, k_action, k_params = jax.random.split(key, 3)
    state = jax.random.normal(k_state, (batch, state_dim), dtype=jnp.float32)
    action = jax.random.normal(k_action, (batch, action_dim), dtype=jnp.float32)
    params = init_params(k_params, state_dim, action_dim, hidden_dims, n_Q)

    # One-time repack into the kernel layout (auto-selects the block-diagonal
    # fused layout on 256-wide-MXU chips, per-member layout on v5e).
    packed, meta = pack_params(params, state_dim)

    fwd = jax.jit(partial(ensemble_critic_forward, **meta))
    q_kernel = fwd(state, action, packed)
    jax.block_until_ready(q_kernel)

    q_ref = reference_forward(state, action, params)
    assert q_kernel.shape == (batch, n_Q)
    max_err = float(jnp.max(jnp.abs(q_kernel - q_ref)))
    assert jnp.allclose(q_kernel, q_ref, atol=5e-5, rtol=5e-5), max_err

    print("KERNEL_OK")
</pallas_src>

<mosaic_0001>
module attributes {stable_mosaic.version = 11 : i64} {
  func.func @_kernel_fused(%arg0: memref<8x12xf32, #tpu.memory_space<vmem>>, %arg1: memref<8x4xf32, #tpu.memory_space<vmem>>, %arg2: memref<12x256xf32, #tpu.memory_space<vmem>>, %arg3: memref<4x256xf32, #tpu.memory_space<vmem>>, %arg4: memref<1x256xf32, #tpu.memory_space<vmem>>, %arg5: memref<256x256xf32, #tpu.memory_space<vmem>>, %arg6: memref<1x256xf32, #tpu.memory_space<vmem>>, %arg7: memref<256x2xf32, #tpu.memory_space<vmem>>, %arg8: memref<1x2xf32, #tpu.memory_space<vmem>>, %arg9: memref<8x2xf32, #tpu.memory_space<vmem>>) attributes {dimension_semantics = [], scalar_prefetch = 0 : i64, scratch_operands = 0 : i64, tpu.core_type = #tpu.core_type<tc>} {
    %c0 = arith.constant 0 : index
    %c0_0 = arith.constant 0 : index
    %0 = vector.load %arg0[%c0, %c0_0] : memref<8x12xf32, #tpu.memory_space<vmem>>, vector<8x12xf32>
    %c0_1 = arith.constant 0 : index
    %c0_2 = arith.constant 0 : index
    %1 = vector.load %arg2[%c0_1, %c0_2] : memref<12x256xf32, #tpu.memory_space<vmem>>, vector<12x256xf32>
    %cst = arith.constant dense<0.000000e+00> : vector<8x256xf32>
    %2 = tpu.matmul %0, %1, %cst {dimension_numbers = #tpu.dot_dimension_numbers<[1], [0], [0], [1], [0, 0, 1, 1], [], []>} : vector<8x12xf32>, vector<12x256xf32>, vector<8x256xf32> -> vector<8x256xf32>
    %c0_3 = arith.constant 0 : index
    %c0_4 = arith.constant 0 : index
    %3 = vector.load %arg1[%c0_3, %c0_4] : memref<8x4xf32, #tpu.memory_space<vmem>>, vector<8x4xf32>
    %c0_5 = arith.constant 0 : index
    %c0_6 = arith.constant 0 : index
    %4 = vector.load %arg3[%c0_5, %c0_6] : memref<4x256xf32, #tpu.memory_space<vmem>>, vector<4x256xf32>
    %cst_7 = arith.constant dense<0.000000e+00> : vector<8x256xf32>
    %5 = tpu.matmul %3, %4, %cst_7 {dimension_numbers = #tpu.dot_dimension_numbers<[1], [0], [0], [1], [0, 0, 1, 1], [], []>} : vector<8x4xf32>, vector<4x256xf32>, vector<8x256xf32> -> vector<8x256xf32>
    %6 = arith.addf %2, %5 : vector<8x256xf32>
    %c0_8 = arith.constant 0 : index
    %c0_9 = arith.constant 0 : index
    %7 = vector.load %arg4[%c0_8, %c0_9] : memref<1x256xf32, #tpu.memory_space<vmem>>, vector<1x256xf32>
    %8 = vector.broadcast %7 : vector<1x256xf32> to vector<8x256xf32>
    %9 = arith.addf %6, %8 : vector<8x256xf32>
    %cst_10 = arith.constant 0.000000e+00 : f32
    %10 = vector.broadcast %cst_10 : f32 to vector<8x256xf32>
    %11 = arith.maximumf %9, %10 : vector<8x256xf32>
    %c0_11 = arith.constant 0 : index
    %c0_12 = arith.constant 0 : index
    %12 = vector.load %arg5[%c0_11, %c0_12] : memref<256x256xf32, #tpu.memory_space<vmem>>, vector<256x256xf32>
    %cst_13 = arith.constant dense<0.000000e+00> : vector<8x256xf32>
    %13 = tpu.matmul %11, %12, %cst_13 {dimension_numbers = #tpu.dot_dimension_numbers<[1], [0], [0], [1], [0, 0, 1, 1], [], []>} : vector<8x256xf32>, vector<256x256xf32>, vector<8x256xf32> -> vector<8x256xf32>
    %c0_14 = arith.constant 0 : index
    %c0_15 = arith.constant 0 : index
    %14 = vector.load %arg6[%c0_14, %c0_15] : memref<1x256xf32, #tpu.memory_space<vmem>>, vector<1x256xf32>
    %15 = vector.broadcast %14 : vector<1x256xf32> to vector<8x256xf32>
    %16 = arith.addf %13, %15 : vector<8x256xf32>
    %cst_16 = arith.constant 0.000000e+00 : f32
    %17 = vector.broadcast %cst_16 : f32 to vector<8x256xf32>
    %18 = arith.maximumf %16, %17 : vector<8x256xf32>
    %c0_17 = arith.constant 0 : index
    %c0_18 = arith.constant 0 : index
    %19 = vector.load %arg7[%c0_17, %c0_18] : memref<256x2xf32, #tpu.memory_space<vmem>>, vector<256x2xf32>
    %cst_19 = arith.constant dense<0.000000e+00> : vector<8x2xf32>
    %20 = tpu.matmul %18, %19, %cst_19 {dimension_numbers = #tpu.dot_dimension_numbers<[1], [0], [0], [1], [0, 0, 1, 1], [], []>} : vector<8x256xf32>, vector<256x2xf32>, vector<8x2xf32> -> vector<8x2xf32>
    %c0_20 = arith.constant 0 : index
    %c0_21 = arith.constant 0 : index
    %21 = vector.load %arg8[%c0_20, %c0_21] : memref<1x2xf32, #tpu.memory_space<vmem>>, vector<1x2xf32>
    %22 = vector.broadcast %21 : vector<1x2xf32> to vector<8x2xf32>
    %23 = arith.addf %20, %22 : vector<8x2xf32>
    %c0_22 = arith.constant 0 : index
    %c0_23 = arith.constant 0 : index
    %24 = vector.load %arg9[%c0_22, %c0_23] : memref<8x2xf32, #tpu.memory_space<vmem>>, vector<8x2xf32>
    tpu.vector_store %arg9[%c0_22, %c0_23], %23 {strides = array<i32>} : memref<8x2xf32, #tpu.memory_space<vmem>>, vector<8x2xf32>,
    return
  }
}

</mosaic_0001>

<bundles_post_ra>
// kernel: ensemble_critic_forward.1
= control target key start
LH: loop header
LB: loop body
LE: loop exit
PB: predicated region body
PF: predicated region fallthrough
CT: control target
= control target key end

     0   :  { %14 = vsyncpa [#allocation3], 0  ;;  %s673_s30 = smov [#allocation2]   ;;  %s880_s0 = inlined_call_operand.vmem [shape: f32[8,12], index: 0, kind: input, shape index: {}]   ;;  %s881_s1 = inlined_call_operand.vmem [shape: f32[8,4], index: 1, kind: input, shape index: {}]   ;;  %s882_s2 = inlined_call_operand.vmem [shape: f32[12,256], index: 2, kind: input, shape index: {}]   ;;  %s883_s3 = inlined_call_operand.vmem [shape: f32[4,256], index: 3, kind: input, shape index: {}]   ;;  %s884_s4 = inlined_call_operand.vmem [shape: f32[1,256], index: 4, kind: input, shape index: {}]   ;;  %s885_s5 = inlined_call_operand.hbm [shape: f32[256,256], index: 5, kind: input, shape index: {}]   ;;  %s886_s6 = inlined_call_operand.vmem [shape: f32[1,256], index: 6, kind: input, shape index: {}]   ;;  %s887_s7 = inlined_call_operand.vmem [shape: f32[256,2], index: 7, kind: input, shape index: {}]   ;;  %s888_s8 = inlined_call_operand.vmem [shape: f32[1,2], index: 8, kind: input, shape index: {}]   ;;  %s889_s9 = inlined_call_operand.vmem [shape: f32[8,2], index: 9, kind: output, shape index: {}]  }
   0x1   :  { %s30_s10 = sshll.u32 %s673_s30, 4  ;;  %s649_s13 = scalar_lea.hbm %s885_s5, 8192  ;;  %s31_s10 = int_to_ptr.vmem [resolvable:$true] %s30_s10 }
   0x2   :  { %p650_p0 = scmp.ne.s32.totalorder %s885_s5, %s649_s13  ;;  %p653_p1 = scmp.lt.u32.totalorder %s649_s13, %s885_s5 }
   0x4   :  { %p655_p2 = pnand %p653_p1, %p650_p0 }
   0x6   :  { %658 = shalt.err (!%p655_p2)
}
   0x7   :  { %s659_s18 = scalar_lea.vmem %s31_s10, 8192  ;;  %p664_p4 = scmp.lt.s32.totalorder %s31_s10, %s31_s10 }
   0x8   :  { %p660_p3 = scmp.ne.s32.totalorder %s31_s10, %s659_s18  ;;  %p665_p5 = scmp.lt.s32.totalorder %s659_s18, %s659_s18 }
   0xa   :  { %p666_p6 = por %p665_p5, %p664_p4 }
   0xc   :  { %p667_p7 = pnand %p666_p6, %p660_p3 }
   0xe   :  { %670 = shalt.err (!%p667_p7)
}
   0xf   :  { %s674_s19 = smov 256   ;;  %s675_s20 = smov 16  }
  0x10   :  { %36 = dma.hbm_to_vmem [thread:$0]  %s885_s5, 8192, %s31_s10, [#allocation3], %s674_s19, %s674_s19, %s675_s20  }
  0x11   :  { %671 = dma.done.wait [#allocation3], 8192  }
  0x12   :  { %672 = vsyncadd [#allocation3], 4294959104  ;;  %v676_v0 = vmov 0.0   ;;  %vm59_vm0 = vcmask 1043456   ;;  %v52_v1 = vld [vmem:[%s883_s3] sm:$0xff]  ;;  %v48_v2 = vld [vmem:[%s882_s2 + $0x8] sm:$0xff] }
  0x13   :  { %128 = vmatprep.mubr.f32.mxu0 %v676_v0  ;;  %vm677_vm1 = vmmov 1   ;;  %v54_v4 = vcombine.high %v52_v1, %v52_v1  ;;  %v50_v5 = vld [vmem:[%s882_s2 + $0x18] sm:$0xf]  ;;  %v47_v6 = vld [vmem:[%s882_s2] sm:$0xff]  ;;  %v49_v7 = vld [vmem:[%s882_s2 + $0x10] sm:$0xf] }
  0x14   :  { %vm747_vm2 = vmpackc.low %vm59_vm0, %vm677_vm1  ;;  %v51_v8 = vld [vmem:[%s881_s1] sm:$0xff]  ;;  %vm55_vm3 = vcmask 31744   ;;  %v539_v9 = vpack.c.bf16 %v50_v5, %v48_v2  ;;  %v542_v10 = vpack.c.bf16 %v49_v7, %v47_v6  ;;  %v233_v11 = vld [vmem:[#allocation2 + $0x8] sm:$0xff]  ;;  %vm135_vm4 = vcmask 97280  }
  0x15   :  { %v235_v12 = vld [vmem:[#allocation2 + $0x18] sm:$0xff]  ;;  %497 = vmatprep.subr.msk.mxu0 %vm59_vm0, %v54_v4  ;;  %v232_v14 = vld [vmem:[#allocation2] sm:$0xff]  ;;  %v234_v15 = vld [vmem:[#allocation2 + $0x10] sm:$0xff]  ;;  %vm490_vm5 = vcmask 15360  }
  0x16   :  { %v545_v13 = vpack.c.bf16 %v235_v12, %v233_v11  ;;  %v237_v16 = vld [vmem:[#allocation2 + $0x28] sm:$0xff]  ;;  %498 = vmatpush1.msk.msra.mxu0 %vm59_vm0, %v52_v1  ;;  %v547_v17 = vpack.c.bf16 %v234_v15, %v232_v14  ;;  %v239_v18 = vld [vmem:[#allocation2 + $0x38] sm:$0xff]  ;;  %v236_v20 = vld [vmem:[#allocation2 + $0x20] sm:$0xff] }
  0x17   :  { %499 = vmatmul.mubr.msk.f32.vlgmr.msra.gmra.mrb[0].mxu0 %vm55_vm3, %v51_v8  ;;  %541 = vmatprep.subr.msk.bf16.mxu0 %vm747_vm2, %v539_v9  ;;  %v549_v19 = vpack.c.bf16 %v239_v18, %v237_v16  ;;  %v238_v21 = vld [vmem:[#allocation2 + $0x30] sm:$0xff]  ;;  %v241_v22 = vld [vmem:[#allocation2 + $0x48] sm:$0xff]  ;;  %v243_v23 = vld [vmem:[#allocation2 + $0x58] sm:$0xff] }
  0x18   :  { %544 = vmatpush1.bf16.msk.msra.mxu0 %vm747_vm2, %v542_v10  ;;  %209 = vmatprep.mubr.f32.mxu0 %v676_v0  ;;  %v551_v24 = vpack.c.bf16 %v238_v21, %v236_v20  ;;  %v553_v25 = vpack.c.bf16 %v243_v23, %v241_v22  ;;  %v240_v26 = vld [vmem:[#allocation2 + $0x40] sm:$0xff]  ;;  %v242_v27 = vld [vmem:[#allocation2 + $0x50] sm:$0xff]  ;;  %v245_v29 = vld [vmem:[#allocation2 + $0x68] sm:$0xff] }
  0x19   :  { %546 = vmatprep.subr.bf16.mxu1 %v545_v13  ;;  %v46_v28 = vld [vmem:[%s880_s0] sm:$0xff]  ;;  %v247_v30 = vld [vmem:[#allocation2 + $0x78] sm:$0xff]  ;;  %v555_v31 = vpack.c.bf16 %v242_v27, %v240_v26  ;;  %v246_v34 = vld [vmem:[#allocation2 + $0x70] sm:$0xff] }
  0x1a   :  { %548 = vmatpush1.bf16.msra.mxu1 %v547_v17  ;;  %v557_v32 = vpack.c.bf16 %v247_v30, %v245_v29  ;;  %v244_v33 = vld [vmem:[#allocation2 + $0x60] sm:$0xff]  ;;  %v249_v35 = vld [vmem:[#allocation2 + $0x88] sm:$0xff]  ;;  %v251_v36 = vld [vmem:[#allocation2 + $0x98] sm:$0xff] }
  0x1b   :  { %550 = vmatprep.subr.bf16.mxu1 %v549_v19  ;;  %v559_v37 = vpack.c.bf16 %v246_v34, %v244_v33  ;;  %v561_v38 = vpack.c.bf16 %v251_v36, %v249_v35  ;;  %v248_v39 = vld [vmem:[#allocation2 + $0x80] sm:$0xff]  ;;  %v250_v40 = vld [vmem:[#allocation2 + $0x90] sm:$0xff]  ;;  %v253_v41 = vld [vmem:[#allocation2 + $0xa8] sm:$0xff] }
  0x1c   :  { %v255_v42 = vld [vmem:[#allocation2 + $0xb8] sm:$0xff]  ;;  %v563_v43 = vpack.c.bf16 %v250_v40, %v248_v39  ;;  %v252_v45 = vld [vmem:[#allocation2 + $0xa0] sm:$0xff]  ;;  %v254_v46 = vld [vmem:[#allocation2 + $0xb0] sm:$0xff] }
  0x1d   :  { %v565_v44 = vpack.c.bf16 %v255_v42, %v253_v41  ;;  %v257_v47 = vld [vmem:[#allocation2 + $0xc8] sm:$0xff]  ;;  %v259_v48 = vld [vmem:[#allocation2 + $0xd8] sm:$0xff]  ;;  %v567_v49 = vpack.c.bf16 %v254_v46, %v252_v45  ;;  %v256_v51 = vld [vmem:[#allocation2 + $0xc0] sm:$0xff] }
  0x1e   :  { %552 = vmatpush1.bf16.msra.mxu1 %v551_v24  ;;  %v569_v50 = vpack.c.bf16 %v259_v48, %v257_v47  ;;  %v258_v52 = vld [vmem:[#allocation2 + $0xd0] sm:$0xff]  ;;  %v261_v53 = vld [vmem:[#allocation2 + $0xe8] sm:$0xff]  ;;  %v263_v54 = vld [vmem:[#allocation2 + $0xf8] sm:$0xff] }
  0x1f   :  { %502 = vmatmul.mubr.msk.f32.vlgmr.msra.gmra.mrb[0].mxu0 %vm135_vm4, %v46_v28  ;;  %554 = vmatprep.subr.bf16.mxu1 %v553_v25  ;;  %v571_v55 = vpack.c.bf16 %v258_v52, %v256_v51  ;;  %v573_v56 = vpack.c.bf16 %v263_v54, %v261_v53  ;;  %v260_v57 = vld [vmem:[#allocation2 + $0xe0] sm:$0xff]  ;;  %v262_v58 = vld [vmem:[#allocation2 + $0xf0] sm:$0xff]  ;;  %v265_v59 = vld [vmem:[#allocation2 + $0x108] sm:$0xff] }
  0x20   :  { %v267_v60 = vld [vmem:[#allocation2 + $0x118] sm:$0xff]  ;;  %v575_v61 = vpack.c.bf16 %v262_v58, %v260_v57  ;;  %v264_v63 = vld [vmem:[#allocation2 + $0x100] sm:$0xff]  ;;  %v266_v0 = vld [vmem:[#allocation2 + $0x110] sm:$0xff] }
  0x21   :  { %v577_v62 = vpack.c.bf16 %v267_v60, %v265_v59  ;;  %v269_v1 = vld [vmem:[#allocation2 + $0x128] sm:$0xff]  ;;  %v271_v2 = vld [vmem:[#allocation2 + $0x138] sm:$0xff]  ;;  %v579_v3 = vpack.c.bf16 %v266_v0, %v264_v63  ;;  %v268_v5 = vld [vmem:[#allocation2 + $0x120] sm:$0xff] }
  0x22   :  { %556 = vmatpush1.bf16.msra.mxu1 %v555_v31  ;;  %v581_v4 = vpack.c.bf16 %v271_v2, %v269_v1  ;;  %v270_v6 = vld [vmem:[#allocation2 + $0x130] sm:$0xff]  ;;  %v273_v7 = vld [vmem:[#allocation2 + $0x148] sm:$0xff]  ;;  %v275_v8 = vld [vmem:[#allocation2 + $0x158] sm:$0xff] }
  0x23   :  { %558 = vmatprep.subr.bf16.mxu1 %v557_v32  ;;  %v583_v9 = vpack.c.bf16 %v270_v6, %v268_v5  ;;  %v585_v10 = vpack.c.bf16 %v275_v8, %v273_v7  ;;  %v272_v11 = vld [vmem:[#allocation2 + $0x140] sm:$0xff]  ;;  %v274_v12 = vld [vmem:[#allocation2 + $0x150] sm:$0xff]  ;;  %v277_v13 = vld [vmem:[#allocation2 + $0x168] sm:$0xff] }
  0x24   :  { %v279_v14 = vld [vmem:[#allocation2 + $0x178] sm:$0xff]  ;;  %v587_v15 = vpack.c.bf16 %v274_v12, %v272_v11  ;;  %v276_v17 = vld [vmem:[#allocation2 + $0x160] sm:$0xff]  ;;  %v278_v18 = vld [vmem:[#allocation2 + $0x170] sm:$0xff] }
  0x25   :  { %v589_v16 = vpack.c.bf16 %v279_v14, %v277_v13  ;;  %v281_v19 = vld [vmem:[#allocation2 + $0x188] sm:$0xff]  ;;  %v283_v20 = vld [vmem:[#allocation2 + $0x198] sm:$0xff]  ;;  %v591_v21 = vpack.c.bf16 %v278_v18, %v276_v17  ;;  %v280_v23 = vld [vmem:[#allocation2 + $0x180] sm:$0xff] }
  0x26   :  { %560 = vmatpush1.bf16.msra.mxu1 %v559_v37  ;;  %v593_v22 = vpack.c.bf16 %v283_v20, %v281_v19  ;;  %v282_v24 = vld [vmem:[#allocation2 + $0x190] sm:$0xff]  ;;  %v285_v25 = vld [vmem:[#allocation2 + $0x1a8] sm:$0xff]  ;;  %v287_v26 = vld [vmem:[#allocation2 + $0x1b8] sm:$0xff]  ;;  %v218_v19 = vlaneseq }
  0x27   :  { %562 = vmatprep.subr.bf16.mxu1 %v561_v38  ;;  %v595_v27 = vpack.c.bf16 %v282_v24, %v280_v23  ;;  %v597_v28 = vpack.c.bf16 %v287_v26, %v285_v25  ;;  %v284_v29 = vld [vmem:[#allocation2 + $0x1a0] sm:$0xff]  ;;  %v286_v30 = vld [vmem:[#allocation2 + $0x1b0] sm:$0xff]  ;;  %v289_v31 = vld [vmem:[#allocation2 + $0x1c8] sm:$0xff] }
  0x28   :  { %v291_v32 = vld [vmem:[#allocation2 + $0x1d8] sm:$0xff]  ;;  %v599_v33 = vpack.c.bf16 %v286_v30, %v284_v29  ;;  %v288_v35 = vld [vmem:[#allocation2 + $0x1c0] sm:$0xff]  ;;  %v290_v36 = vld [vmem:[#allocation2 + $0x1d0] sm:$0xff]  ;;  %v219_v20 = vshrl.u32 %v218_v19, 7 }
  0x29   :  { %v601_v34 = vpack.c.bf16 %v291_v32, %v289_v31  ;;  %v603_v37 = vpack.c.bf16 %v290_v36, %v288_v35  ;;  %v293_v38 = vld [vmem:[#allocation2 + $0x1e8] sm:$0xff]  ;;  %v295_v39 = vld [vmem:[#allocation2 + $0x1f8] sm:$0xff]  ;;  %v292_v41 = vld [vmem:[#allocation2 + $0x1e0] sm:$0xff] }
  0x2a   :  { %564 = vmatpush1.bf16.msra.mxu1 %v563_v43  ;;  %v605_v40 = vpack.c.bf16 %v295_v39, %v293_v38  ;;  %v294_v42 = vld [vmem:[#allocation2 + $0x1f0] sm:$0xff]  ;;  %v398_v45 = vld [vmem:[%s887_s7 + $0x88] sm:$0xff]  ;;  %v381_v46 = vld [vmem:[%s887_s7] sm:$0xff]  ;;  %v224_v23 = vsub.s32 1, %v219_v20 }
  0x2b   :  { %566 = vmatprep.subr.bf16.mxu1 %v565_v44  ;;  %v607_v43 = vpack.c.bf16 %v294_v42, %v292_v41  ;;  %v397_v44 = vld [vmem:[%s887_s7 + $0x80] sm:$0xff]  ;;  %v382_v48 = vld [vmem:[%s887_s7 + $0x8] sm:$0xff]  ;;  %v383_v53 = vld [vmem:[%s887_s7 + $0x10] sm:$0xff] }
  0x2c   :  { %v609_v47 = vpack.c.bf16 %v398_v45, %v397_v44  ;;  %v611_v51 = vpack.c.bf16 %v382_v48, %v381_v46  ;;  %v384_v54 = vld [vmem:[%s887_s7 + $0x18] sm:$0xff]  ;;  %v385_v59 = vld [vmem:[%s887_s7 + $0x20] sm:$0xff]  ;;  %v386_v60 = vld [vmem:[%s887_s7 + $0x28] sm:$0xff] }
  0x2d   :  { %v615_v57 = vpack.c.bf16 %v384_v54, %v383_v53  ;;  %v619_v63 = vpack.c.bf16 %v386_v60, %v385_v59  ;;  %v387_v1 = vld [vmem:[%s887_s7 + $0x30] sm:$0xff]  ;;  %v388_v2 = vld [vmem:[%s887_s7 + $0x38] sm:$0xff]  ;;  %v389_v7 = vld [vmem:[%s887_s7 + $0x40] sm:$0xff] }
  0x2e   :  { %568 = vmatpush1.bf16.msra.mxu1 %v567_v49  ;;  %v399_v49 = vld [vmem:[%s887_s7 + $0x90] sm:$0xff]  ;;  %610 = vmatprep.subr.bf16.mxu0 %v609_v47  ;;  %v623_v5 = vpack.c.bf16 %v388_v2, %v387_v1  ;;  %v390_v8 = vld [vmem:[%s887_s7 + $0x48] sm:$0xff]  ;;  %v392_v14 = vld [vmem:[%s887_s7 + $0x58] sm:$0xff] }
  0x2f   :  { %570 = vmatprep.subr.bf16.mxu1 %v569_v50  ;;  %v400_v50 = vld [vmem:[%s887_s7 + $0x98] sm:$0xff]  ;;  %612 = vmatpush3.bf16.msra.mxu0 %v611_v51  ;;  %v627_v11 = vpack.c.bf16 %v390_v8, %v389_v7  ;;  %v391_v13 = vld [vmem:[%s887_s7 + $0x50] sm:$0xff]  ;;  %v393_v32 = vld [vmem:[%s887_s7 + $0x60] sm:$0xff] }
  0x30   :  { %v613_v52 = vpack.c.bf16 %v400_v50, %v399_v49  ;;  %v631_v17 = vpack.c.bf16 %v392_v14, %v391_v13  ;;  %v411_v35 = vld [vmem:[%s887_s7 + $0xf0] sm:$0xff]  ;;  %v412_v36 = vld [vmem:[%s887_s7 + $0xf8] sm:$0xff]  ;;  %v296_v41 = vld [vmem:[%s886_s6] sm:$0x3] }
  0x31   :  { %v395_v38 = vld [vmem:[%s887_s7 + $0x70] sm:$0xff]  ;;  %v396_v39 = vld [vmem:[%s887_s7 + $0x78] sm:$0xff]  ;;  %v503_v51 = vld [vmem:[%s888_s8] ss:$0 sm:$0xff] }
  0x32   :  { %572 = vmatpush1.bf16.msra.mxu1 %v571_v55  ;;  %v401_v55 = vld [vmem:[%s887_s7 + $0xa0] sm:$0xff]  ;;  %614 = vmatprep.subr.bf16.mxu0 %v613_v52 }
  0x33   :  { %574 = vmatprep.subr.bf16.mxu1 %v573_v56  ;;  %v402_v56 = vld [vmem:[%s887_s7 + $0xa8] sm:$0xff]  ;;  %616 = vmatpush3.bf16.msra.mxu0 %v615_v57 }
  0x34   :  { %v617_v58 = vpack.c.bf16 %v402_v56, %v401_v55 }
  0x36   :  { %576 = vmatpush1.bf16.msra.mxu1 %v575_v61  ;;  %v403_v61 = vld [vmem:[%s887_s7 + $0xb0] sm:$0xff]  ;;  %618 = vmatprep.subr.bf16.mxu0 %v617_v58 }
  0x37   :  { %578 = vmatprep.subr.bf16.mxu1 %v577_v62  ;;  %v404_v62 = vld [vmem:[%s887_s7 + $0xb8] sm:$0xff]  ;;  %620 = vmatpush3.bf16.msra.mxu0 %v619_v63 }
  0x38   :  { %v621_v0 = vpack.c.bf16 %v404_v62, %v403_v61 }
  0x3a   :  { %580 = vmatpush1.bf16.msra.mxu1 %v579_v3  ;;  %v405_v3 = vld [vmem:[%s887_s7 + $0xc0] sm:$0xff]  ;;  %622 = vmatprep.subr.bf16.mxu0 %v621_v0 }
  0x3b   :  { %582 = vmatprep.subr.bf16.mxu1 %v581_v4  ;;  %v406_v4 = vld [vmem:[%s887_s7 + $0xc8] sm:$0xff]  ;;  %624 = vmatpush3.bf16.msra.mxu0 %v623_v5 }
  0x3c   :  { %v625_v6 = vpack.c.bf16 %v406_v4, %v405_v3 }
  0x3e   :  { %584 = vmatpush1.bf16.msra.mxu1 %v583_v9  ;;  %v407_v9 = vld [vmem:[%s887_s7 + $0xd0] sm:$0xff]  ;;  %626 = vmatprep.subr.bf16.mxu0 %v625_v6 }
  0x3f   :  { %586 = vmatprep.subr.bf16.mxu1 %v585_v10  ;;  %v408_v10 = vld [vmem:[%s887_s7 + $0xd8] sm:$0xff]  ;;  %628 = vmatpush3.bf16.msra.mxu0 %v627_v11 }
  0x40   :  { %v629_v12 = vpack.c.bf16 %v408_v10, %v407_v9 }
  0x42   :  { %588 = vmatpush1.bf16.msra.mxu1 %v587_v15  ;;  %v409_v15 = vld [vmem:[%s887_s7 + $0xe0] sm:$0xff]  ;;  %630 = vmatprep.subr.bf16.mxu0 %v629_v12 }
  0x43   :  { %590 = vmatprep.subr.bf16.mxu1 %v589_v16  ;;  %v410_v16 = vld [vmem:[%s887_s7 + $0xe8] sm:$0xff]  ;;  %632 = vmatpush3.bf16.msra.mxu0 %v631_v17 }
  0x44   :  { %v633_v18 = vpack.c.bf16 %v410_v16, %v409_v15 }
  0x46   :  { %592 = vmatpush1.bf16.msra.mxu1 %v591_v21  ;;  %634 = vmatprep.subr.bf16.mxu0 %v633_v18  ;;  %v220_v21 = vsub.s32 0, %v219_v20 }
  0x47   :  { %594 = vmatprep.subr.bf16.mxu1 %v593_v22  ;;  %v216_v22 = vld [vmem:[%s884_s4] sm:$0x3] }
  0x48   :  { %v221_v24 = vrot.slane %v216_v22, %v220_v21  ;;  %v225_v25 = vrot.slane %v216_v22, %v224_v23  ;;  %v301_v42 = vrot.slane %v296_v41, %v220_v21 }
  0x4a   :  { %596 = vmatpush1.bf16.msra.mxu1 %v595_v27 }
  0x4b   :  { %598 = vmatprep.subr.bf16.mxu1 %v597_v28 }
  0x4e   :  { %600 = vmatpush1.bf16.msra.mxu1 %v599_v33  ;;  %v394_v33 = vld [vmem:[%s887_s7 + $0x68] sm:$0xff] }
  0x4f   :  { %602 = vmatprep.subr.bf16.mxu1 %v601_v34  ;;  %v635_v34 = vpack.c.bf16 %v394_v33, %v393_v32 }
  0x51   :  { %636 = vmatpush3.bf16.msra.mxu0 %v635_v34 }
  0x52   :  { %604 = vmatpush1.bf16.msra.mxu1 %v603_v37  ;;  %v637_v37 = vpack.c.bf16 %v412_v36, %v411_v35 }
  0x53   :  { %606 = vmatprep.subr.bf16.mxu1 %v605_v40  ;;  %v639_v40 = vpack.c.bf16 %v396_v39, %v395_v38 }
  0x54   :  { %638 = vmatprep.subr.bf16.mxu0 %v637_v37 }
  0x55   :  { %640 = vmatpush3.bf16.msra.mxu0 %v639_v40 }
  0x56   :  { %608 = vmatpush1.bf16.msra.mxu1 %v607_v43  ;;  %v305_v43 = vrot.slane %v296_v41, %v224_v23 }
  0xf2   :  { %v211_v26 = vpop.f32.mrb[0].mxu0 }
  0xf3   :  { %v228_v27 = vadd.f32 %v221_v24, %v211_v26  ;;  %v213_v28 = vpop.f32.mrb[1].mxu0 }
  0xf4   :  { %v229_v29 = vadd.f32 %v225_v25, %v213_v28 }
  0xf5   :  { %v230_v31 = vmax.f32 %v228_v27, 0.0 }
  0xf6   :  { %v231_v30 = vmax.f32 %v229_v29, 0.0 }
  0xf8   :  { %372 = vmatprep.mubr.f32.mxu1 %v231_v30 }
  0xf9   :  { %373 = vmatmul.mubr.f32.vlgmr.msra.gmra.mrb[0].mxu1 %v230_v31 }
 0x1cc   :  { %v374_v44 = vpop.f32.mrb[0].mxu1 }
 0x1cd   :  { %v375_v45 = vadd.f32 %v374_v44, %v301_v42  ;;  %v376_v46 = vpop.f32.mrb[1].mxu1 }
 0x1ce   :  { %v377_v47 = vadd.f32 %v376_v46, %v305_v43 }
 0x1cf   :  { %v379_v49 = vmax.f32 %v375_v45, 0.0 }
 0x1d0   :  { %v380_v48 = vmax.f32 %v377_v47, 0.0 }
 0x1d2   :  { %484 = vmatprep.mubr.f32.mxu0 %v380_v48 }
 0x1d3   :  { %485 = vmatmul.mubr.f32.vlgmr.msra.gmra.mrb[2].mxu0 %v379_v49 }
 0x2a6   :  { %v536_v50 = vpop.f32.mrb[2].mxu0 }
 0x2a7   :  { %v537_v52 = vpop.f32.mrb[3].mxu0 }
 0x2a8   :  { %v538_v53 = vadd.f32 %v537_v52, %v536_v50 }
 0x2aa   :  { %v487_v54 = vadd.f32 %v538_v53, %v503_v51 }
 0x2ac   :  { %491 = vst.msk [vmem:[%s889_s9] sm:$0xff] %vm490_vm5, %v487_v54 }
 0x2ad   :  { %496 = vsyncpa [#allocation3], 1 }

</bundles_post_ra>
